<compile_context>
chip_gen: v7x
topology: tpu7x:2x2x1
jax: 0.10.0
libtpu: 0.0.40
codegen_flags: <defaults>
</compile_context>

<pallas_src>
import functools

import numpy as np

import jax
import jax.numpy as jnp
from jax.experimental import pallas as pl
from jax.experimental.pallas import tpu as pltpu


# ----------------------------------------------------------------------------
# Parameter re-layout (done once, host side): fold the kw taps and the W-dim
# zero padding of a 3x3 conv into kh-stacked row-Toeplitz matmul weights.
# ----------------------------------------------------------------------------

def conv3x3_to_row_toeplitz(w_hwio, W):
    """(3, 3, Cin, Cout) HWIO weights -> (3*W*Cin, W*Cout) Toeplitz weights.

    Row index = kh*W*Cin + w_in*Cin + c, column index = w_out*Cout + o.
    Out-of-range kw taps (the 'SAME' zero padding along W) are simply absent,
    so the kernel only has to handle the H border (roll + mask).

    NOTE (v7x VMEM hazard): this layout scales as 3*W^2*Cin*Cout (bf16 here).
    At W=16, C<=8 the total weight footprint is <0.2 MiB — fine on every chip.
    For much larger W/C, switch to a lane-roll formulation (K = 9*Cin) or at
    least keep bf16 + pl.Buffered(1) on the grid-invariant weight blocks so it
    still fits v7x's 64 MiB VMEM.
    """
    w = np.asarray(w_hwio, np.float32)
    _, _, cin, cout = w.shape
    t = np.zeros((3, W * cin, W * cout), np.float32)
    for kh in range(3):
        for kw in range(3):
            for wo in range(W):
                wi = wo + kw - 1
                if 0 <= wi < W:
                    t[kh, wi * cin:(wi + 1) * cin,
                      wo * cout:(wo + 1) * cout] = w[kh, kw]
    return jnp.asarray(t.reshape(3 * W * cin, W * cout))


# ----------------------------------------------------------------------------
# Fused Pallas kernel: conv1 -> conv2 -> residual add -> GAP -> linear head
# ----------------------------------------------------------------------------

def fused_supernet_kernel(x_ref, t1_ref, b1_ref, t2_ref, b2_ref,
                          wf_ref, bf_ref, o_ref, *, H, nb):
    # x_ref : (nb*H, W*Cin)       f32, nb images with rows on the sublane axis
    # t1_ref: (3*W*Cin,  W*Cmid)  bf16, kh-stacked row-Toeplitz conv1 weights
    # t2_ref: (3*W*Cmid, W*Cmid)  bf16, kh-stacked row-Toeplitz conv2 weights
    # b1/b2 : (1, W*Cmid)         f32, biases tiled along W (lane-dense)
    # wf_ref: (W*Cmid, KPAD)      bf16, head weights, GAP mean folded in,
    #                             zero-padded to 128 lanes
    # bf_ref: (1, KPAD)           f32
    # o_ref : (nb, KPAD)          f32, lane-dense logits (valid in [:, :K])
    M = x_ref.shape[0]                      # nb * H
    x2d = x_ref[...]

    def conv3x3_relu(x2d, t_ref, b_ref):
        # SAME 3x3 cross-correlation as ONE MXU matmul: [up, center, down]
        # stacked along lanes (K = 3*W*C) against kh-stacked Toeplitz weights.
        # H-border zero padding = sublane roll + per-image (rows % H) mask so
        # the roll never leaks across image boundaries; W-border padding is
        # already folded into the Toeplitz weights.  MXU operands are bf16,
        # accumulation f32; mask/bias/relu stay f32.
        rows = jax.lax.broadcasted_iota(jnp.int32, x2d.shape, 0) % H
        up = jnp.where(rows >= 1, pltpu.roll(x2d, shift=1, axis=0), 0.0)
        down = jnp.where(rows <= H - 2,
                         pltpu.roll(x2d, shift=M - 1, axis=0), 0.0)
        stacked = jnp.concatenate([up, x2d, down], axis=-1).astype(jnp.bfloat16)
        acc = jnp.dot(stacked, t_ref[...], preferred_element_type=jnp.float32)
        return jnp.maximum(acc + b_ref[...], 0.0)        # (M, W*Cout) f32

    c1 = conv3x3_relu(x2d, t1_ref, b1_ref)               # (M, W*Cmid)
    c2 = conv3x3_relu(c1, t2_ref, b2_ref)                 # (M, W*Cmid)
    s = c1 + c2                                           # residual add

    # Per-image sum over H FIRST (cheap tile-aligned sublane reduces), THEN a
    # single lane-dense head matmul (nb, W*Cmid) @ (W*Cmid, 128).  The GAP
    # 1/(H*W) mean is folded into wf_ref; padded lanes of wf/bf are zero.
    pooled = jnp.concatenate(
        [jnp.sum(s[i * H:(i + 1) * H, :], axis=0, keepdims=True)
         for i in range(nb)], axis=0)                     # (nb, W*Cmid) f32
    logits = jnp.dot(pooled.astype(jnp.bfloat16), wf_ref[...],
                     preferred_element_type=jnp.float32) + bf_ref[...]
    o_ref[...] = logits                                   # full-128-lane store


def fused_supernet_block(x_nhwc, t1, b1t, t2, b2t, wf_pool, bf_pad,
                         *, num_classes):
    """conv3x3+relu -> conv3x3+relu -> residual add -> GAP -> linear head."""
    N, H, W, Cin = x_nhwc.shape
    WCin = W * Cin
    WCmid = t1.shape[-1]
    KPAD = wf_pool.shape[-1]

    # Whole batch folded into one block: M = N*H MXU rows in a single grid
    # step (the old per-image grid was dominated by per-step overhead and
    # M=16 row utilization).  For large N, chunk the batch instead: nb a
    # multiple of 8 so M = nb*H ~ 128/256, and keep >= 2 "parallel" steps so
    # both v7x TensorCores get work.
    nb = N
    grid = (N // nb,)

    x2d = x_nhwc.reshape(N * H, WCin)     # (N,H) on sublanes, (W,C) on lanes
    kernel = functools.partial(fused_supernet_kernel, H=H, nb=nb)
    out = pl.pallas_call(
        kernel,
        out_shape=jax.ShapeDtypeStruct((N, KPAD), jnp.float32),
        grid=grid,
        in_specs=[
            pl.BlockSpec((nb * H, WCin), lambda n: (n, 0)),
            pl.BlockSpec((t1.shape[0], WCmid), lambda n: (0, 0)),
            pl.BlockSpec((1, WCmid), lambda n: (0, 0)),
            pl.BlockSpec((t2.shape[0], WCmid), lambda n: (0, 0)),
            pl.BlockSpec((1, WCmid), lambda n: (0, 0)),
            pl.BlockSpec((WCmid, KPAD), lambda n: (0, 0)),
            pl.BlockSpec((1, KPAD), lambda n: (0, 0)),
        ],
        out_specs=pl.BlockSpec((nb, KPAD), lambda n: (n, 0)),
        compiler_params=pltpu.CompilerParams(
            dimension_semantics=("parallel",)),
    )(x2d, t1, b1t, t2, b2t, wf_pool, bf_pad)
    return out[:, :num_classes]           # drop the zero-padded classes


fused_supernet_block_jit = jax.jit(fused_supernet_block,
                                   static_argnames=("num_classes",))


# ----------------------------------------------------------------------------
# Minimal directed-graph container (replaces networkx)
# ----------------------------------------------------------------------------

class SimpleDiGraph:
    def __init__(self):
        self.node = {}
        self._succ = {}
        self._pred = {}

    def add_node(self, name, **attrs):
        self.node[name] = dict(attrs)
        self._succ.setdefault(name, [])
        self._pred.setdefault(name, [])

    def add_edge(self, u, v):
        self._succ[u].append(v)
        self._pred[v].append(u)

    def successors(self, name):
        return list(self._succ[name])

    def topological_sort(self):  # Kahn's algorithm
        indeg = {n: len(self._pred[n]) for n in self.node}
        ready = [n for n in self.node if indeg[n] == 0]
        order = []
        while ready:
            n = ready.pop(0)
            order.append(n)
            for s in self._succ[n]:
                indeg[s] -= 1
                if indeg[s] == 0:
                    ready.append(s)
        if len(order) != len(self.node):
            raise ValueError("The Super Network must be a DAG.")
        return order


# ----------------------------------------------------------------------------
# SuperNetwork: same forward-pass semantics as the PyTorch module
# ----------------------------------------------------------------------------

class SuperNetwork:
    # TODO(synk): get_ops_per_node / get_params_per_node rely on torch module
    # introspection (get_flop_cost, .parameters()) and are not translated.

    def __init__(self):
        self.net = None
        self.traversal_order = None
        self.in_nodes = None
        self.out_nodes = None
        self.observer = None
        self.output_index = None
        self.node_hook = None

    def set_graph(self, network, in_nodes, out_nodes):
        self.net = network
        self.traversal_order = list(network.topological_sort())
        if not (self.traversal_order[0] in in_nodes
                and self.traversal_order[-1] in out_nodes):
            raise ValueError('Seems like the given graph is broken.')
        if not isinstance(in_nodes, (tuple, list)):
            raise ValueError('Input nodes should be list or tuple.')
        if not isinstance(out_nodes, (tuple, list)):
            raise ValueError('Output nodes should be list or tuple.')
        self.in_nodes = in_nodes
        self.set_out_nodes(out_nodes)

    def set_out_nodes(self, out_nodes):
        self.output_index = dict((node, i) for i, node in enumerate(out_nodes))
        self.out_nodes = out_nodes

    def forward(self, inputs):
        if isinstance(inputs, jax.Array):
            inputs = [inputs]
        assert len(inputs) == len(self.in_nodes), (
            'Inputs should have as many elements as the number of input nodes.')
        for node, inp in zip(self.in_nodes, inputs):
            self.net.node[node]['input'] = [inp]
        outputs = [None] * len(self.out_nodes)
        for node in self.traversal_order:
            cur_node = self.net.node[node]
            inp = self.format_input(cur_node.pop('input'))
            if isinstance(inp, (tuple, list)) and len(inp) == 0:
                raise RuntimeError('Node {} has no inputs'.format(node))
            out = cur_node['module'](inp)
            if self.node_hook:
                self.node_hook(node, out)
            if node in self.out_nodes:
                outputs[self.output_index[node]] = out
            for succ in self.net.successors(node):
                if 'input' not in self.net.node[succ]:
                    self.net.node[succ]['input'] = []
                self.net.node[succ]['input'].append(out)
        return outputs

    @staticmethod
    def format_input(input):
        if isinstance(input, (tuple, list)) and len(input) == 1:
            input = input[0]
        return input


# ----------------------------------------------------------------------------
# Pure-JAX reference (correctness check of the fused Pallas kernel)
# ----------------------------------------------------------------------------

def reference_forward(x_nhwc, w1, b1, w2, b2, wf, bf):
    def conv(x, w, b):
        y = jax.lax.conv_general_dilated(
            x, w, (1, 1), 'SAME',
            dimension_numbers=('NHWC', 'HWIO', 'NHWC'),
            precision=jax.lax.Precision.HIGHEST)
        return jnp.maximum(y + b, 0.0)
    c1 = conv(x_nhwc, w1, b1)
    c2 = conv(c1, w2, b2)
    s = c1 + c2
    pooled = jnp.mean(s, axis=(1, 2))
    return jnp.dot(pooled, wf, precision=jax.lax.Precision.HIGHEST) + bf


# ----------------------------------------------------------------------------
# Main
# ----------------------------------------------------------------------------

if __name__ == "__main__":
    N, Cin, H, W = 2, 4, 16, 16
    Cmid, num_classes = 8, 10
    KPAD = max(128, ((num_classes + 127) // 128) * 128)   # lane-dense head

    key = jax.random.PRNGKey(0)
    kx, k1, k2, k3, k4, k5 = jax.random.split(key, 6)

    # Deterministic parameter init (synthetic, no checkpoint load).
    w1 = jax.random.normal(k1, (3, 3, Cin, Cmid), jnp.float32) * 0.1
    b1 = jax.random.normal(k2, (Cmid,), jnp.float32) * 0.01
    w2 = jax.random.normal(k3, (3, 3, Cmid, Cmid), jnp.float32) * 0.1
    b2 = jax.random.normal(k4, (Cmid,), jnp.float32) * 0.01
    wf = jax.random.normal(k5, (Cmid, num_classes), jnp.float32) * 0.1
    bf = jnp.zeros((num_classes,), jnp.float32)

    # One-time re-layout into kernel-friendly, lane-dense form:
    #  * kh-stacked Toeplitz conv weights in bf16 (f32 accumulation in-kernel),
    #  * W-tiled biases (f32),
    #  * GAP mean folded into the head weights, head zero-padded to 128 lanes
    #    so the kernel's output store is unmasked / lane-dense.
    t1 = conv3x3_to_row_toeplitz(w1, W).astype(jnp.bfloat16)  # (3*W*Cin,  W*Cmid)
    t2 = conv3x3_to_row_toeplitz(w2, W).astype(jnp.bfloat16)  # (3*W*Cmid, W*Cmid)
    b1t = jnp.tile(b1, W).reshape(1, W * Cmid)
    b2t = jnp.tile(b2, W).reshape(1, W * Cmid)
    wf_pool = jnp.tile(wf, (W, 1)) / float(H * W)             # (W*Cmid, K)
    wf_pool = jnp.pad(
        wf_pool, ((0, 0), (0, KPAD - num_classes))).astype(jnp.bfloat16)
    bf_pad = jnp.pad(bf.reshape(1, -1), ((0, 0), (0, KPAD - num_classes)))

    # DAG: the conv1 -> conv2 -> add -> head sub-graph is fused into a single
    # Pallas kernel node (intermediates stay in VMEM, one launch total).
    g = SimpleDiGraph()
    g.add_node('input', module=lambda x: x)
    g.add_node('block', module=lambda x: fused_supernet_block_jit(
        x, t1, b1t, t2, b2t, wf_pool, bf_pad, num_classes=num_classes))
    g.add_edge('input', 'block')

    net = SuperNetwork()
    net.set_graph(g, in_nodes=['input'], out_nodes=['block'])

    # PyTorch-style NCHW input; convert once to NHWC for the kernel.
    x_nchw = jax.random.normal(kx, (N, Cin, H, W), jnp.float32)
    x_nhwc = jnp.transpose(x_nchw, (0, 2, 3, 1))

    outputs = net.forward(x_nhwc)
    out = jax.block_until_ready(outputs[0])

    ref = jax.block_until_ready(
        reference_forward(x_nhwc, w1, b1, w2, b2, wf, bf))
    assert out.shape == (N, num_classes)
    # bf16 MXU operands (f32 accumulation) vs an all-f32 HIGHEST reference.
    assert jnp.allclose(out, ref, atol=2e-2, rtol=2e-2), "mismatch vs reference"

    print("KERNEL_OK")
</pallas_src>

<mosaic_0001>
module attributes {stable_mosaic.version = 11 : i64} {
  func.func @fused_supernet_kernel(%arg0: i32, %arg1: memref<32x64xf32, #tpu.memory_space<vmem>>, %arg2: memref<192x128xbf16, #tpu.memory_space<vmem>>, %arg3: memref<1x128xf32, #tpu.memory_space<vmem>>, %arg4: memref<384x128xbf16, #tpu.memory_space<vmem>>, %arg5: memref<1x128xf32, #tpu.memory_space<vmem>>, %arg6: memref<128x128xbf16, #tpu.memory_space<vmem>>, %arg7: memref<1x128xf32, #tpu.memory_space<vmem>>, %arg8: memref<2x128xf32, #tpu.memory_space<vmem>>) attributes {dimension_semantics = [#tpu.dimension_semantics<parallel>], iteration_bounds = array<i64: 1>, scalar_prefetch = 0 : i64, scratch_operands = 0 : i64, tpu.core_type = #tpu.core_type<tc>, window_params = [{transform_indices = @transform_0, window_bounds = array<i64: 32, 64>}, {pipeline_mode = #tpu.pipeline_mode<synchronous>, transform_indices = @transform_1, window_bounds = array<i64: 192, 128>}, {pipeline_mode = #tpu.pipeline_mode<synchronous>, transform_indices = @transform_2, window_bounds = array<i64: 1, 128>}, {pipeline_mode = #tpu.pipeline_mode<synchronous>, transform_indices = @transform_3, window_bounds = array<i64: 384, 128>}, {pipeline_mode = #tpu.pipeline_mode<synchronous>, transform_indices = @transform_4, window_bounds = array<i64: 1, 128>}, {pipeline_mode = #tpu.pipeline_mode<synchronous>, transform_indices = @transform_5, window_bounds = array<i64: 128, 128>}, {pipeline_mode = #tpu.pipeline_mode<synchronous>, transform_indices = @transform_6, window_bounds = array<i64: 1, 128>}, {transform_indices = @transform_7, window_bounds = array<i64: 2, 128>}]} {
    %c0 = arith.constant 0 : index
    %c0_0 = arith.constant 0 : index
    %0 = vector.load %arg1[%c0, %c0_0] : memref<32x64xf32, #tpu.memory_space<vmem>>, vector<32x64xf32>
    %1 = tpu.iota {dimensions = array<i32: 0>} : vector<32x64xi32>
    %c16_i32 = arith.constant 16 : i32
    %c0_i32 = arith.constant 0 : i32
    %2 = arith.cmpi eq, %c16_i32, %c0_i32 : i32
    %c1_i32 = arith.constant 1 : i32
    %3 = arith.select %2, %c1_i32, %c16_i32 : i32
    %4 = vector.broadcast %3 : i32 to vector<32x64xi32>
    %5 = arith.remsi %1, %4 : vector<32x64xi32>
    %c0_i32_1 = arith.constant 0 : i32
    %6 = vector.broadcast %c0_i32_1 : i32 to vector<32x64xi32>
    %7 = arith.cmpi ne, %5, %6 : vector<32x64xi32>
    %c0_i32_2 = arith.constant 0 : i32
    %8 = vector.broadcast %c0_i32_2 : i32 to vector<32x64xi32>
    %9 = arith.cmpi slt, %5, %8 : vector<32x64xi32>
    %c0_i32_3 = arith.constant 0 : i32
    %10 = arith.cmpi slt, %3, %c0_i32_3 : i32
    %11 = vector.broadcast %10 : i1 to vector<32x64xi1>
    %12 = vector.broadcast %11 : vector<32x64xi1> to vector<32x64xi1>
    %13 = arith.xori %9, %12 : vector<32x64xi1>
    %14 = arith.andi %13, %7 : vector<32x64xi1>
    %15 = vector.broadcast %3 : i32 to vector<32x64xi32>
    %16 = arith.addi %5, %15 : vector<32x64xi32>
    %17 = arith.select %14, %16, %5 : vector<32x64xi1>, vector<32x64xi32>
    %c1_i32_4 = arith.constant 1 : i32
    %18 = vector.broadcast %c1_i32_4 : i32 to vector<32x64xi32>
    %19 = arith.cmpi sge, %17, %18 : vector<32x64xi32>
    %c1_i32_5 = arith.constant 1 : i32
    %20 = tpu.dynamic_rotate %0 by %c1_i32_5 dim 0 : vector<32x64xf32>, i32 -> vector<32x64xf32>
    %cst = arith.constant 0.000000e+00 : f32
    %21 = vector.broadcast %cst : f32 to vector<32x64xf32>
    %22 = arith.select %19, %20, %21 : vector<32x64xi1>, vector<32x64xf32>
    %c14_i32 = arith.constant 14 : i32
    %23 = vector.broadcast %c14_i32 : i32 to vector<32x64xi32>
    %24 = arith.cmpi sle, %17, %23 : vector<32x64xi32>
    %c31_i32 = arith.constant 31 : i32
    %25 = tpu.dynamic_rotate %0 by %c31_i32 dim 0 : vector<32x64xf32>, i32 -> vector<32x64xf32>
    %cst_6 = arith.constant 0.000000e+00 : f32
    %26 = vector.broadcast %cst_6 : f32 to vector<32x64xf32>
    %27 = arith.select %24, %25, %26 : vector<32x64xi1>, vector<32x64xf32>
    %28 = tpu.concatenate %22, %0, %27 in 1 : vector<32x64xf32>, vector<32x64xf32>, vector<32x64xf32> -> vector<32x192xf32>
    %29 = arith.truncf %28 : vector<32x192xf32> to vector<32x192xbf16>
    %c0_7 = arith.constant 0 : index
    %c0_8 = arith.constant 0 : index
    %30 = vector.load %arg2[%c0_7, %c0_8] : memref<192x128xbf16, #tpu.memory_space<vmem>>, vector<192x128xbf16>
    %cst_9 = arith.constant dense<0.000000e+00> : vector<32x128xf32>
    %31 = tpu.matmul %29, %30, %cst_9 {dimension_numbers = #tpu.dot_dimension_numbers<[1], [0], [0], [1], [0, 0, 1, 1], [], []>} : vector<32x192xbf16>, vector<192x128xbf16>, vector<32x128xf32> -> vector<32x128xf32>
    %c0_10 = arith.constant 0 : index
    %c0_11 = arith.constant 0 : index
    %32 = vector.load %arg3[%c0_10, %c0_11] : memref<1x128xf32, #tpu.memory_space<vmem>>, vector<1x128xf32>
    %33 = vector.broadcast %32 : vector<1x128xf32> to vector<32x128xf32>
    %34 = arith.addf %31, %33 : vector<32x128xf32>
    %cst_12 = arith.constant 0.000000e+00 : f32
    %35 = vector.broadcast %cst_12 : f32 to vector<32x128xf32>
    %36 = arith.maximumf %34, %35 : vector<32x128xf32>
    %37 = tpu.iota {dimensions = array<i32: 0>} : vector<32x128xi32>
    %c16_i32_13 = arith.constant 16 : i32
    %c0_i32_14 = arith.constant 0 : i32
    %38 = arith.cmpi eq, %c16_i32_13, %c0_i32_14 : i32
    %c1_i32_15 = arith.constant 1 : i32
    %39 = arith.select %38, %c1_i32_15, %c16_i32_13 : i32
    %40 = vector.broadcast %39 : i32 to vector<32x128xi32>
    %41 = arith.remsi %37, %40 : vector<32x128xi32>
    %c0_i32_16 = arith.constant 0 : i32
    %42 = vector.broadcast %c0_i32_16 : i32 to vector<32x128xi32>
    %43 = arith.cmpi ne, %41, %42 : vector<32x128xi32>
    %c0_i32_17 = arith.constant 0 : i32
    %44 = vector.broadcast %c0_i32_17 : i32 to vector<32x128xi32>
    %45 = arith.cmpi slt, %41, %44 : vector<32x128xi32>
    %c0_i32_18 = arith.constant 0 : i32
    %46 = arith.cmpi slt, %39, %c0_i32_18 : i32
    %47 = vector.broadcast %46 : i1 to vector<32x128xi1>
    %48 = vector.broadcast %47 : vector<32x128xi1> to vector<32x128xi1>
    %49 = arith.xori %45, %48 : vector<32x128xi1>
    %50 = arith.andi %49, %43 : vector<32x128xi1>
    %51 = vector.broadcast %39 : i32 to vector<32x128xi32>
    %52 = arith.addi %41, %51 : vector<32x128xi32>
    %53 = arith.select %50, %52, %41 : vector<32x128xi1>, vector<32x128xi32>
    %c1_i32_19 = arith.constant 1 : i32
    %54 = vector.broadcast %c1_i32_19 : i32 to vector<32x128xi32>
    %55 = arith.cmpi sge, %53, %54 : vector<32x128xi32>
    %c1_i32_20 = arith.constant 1 : i32
    %56 = tpu.dynamic_rotate %36 by %c1_i32_20 dim 0 : vector<32x128xf32>, i32 -> vector<32x128xf32>
    %cst_21 = arith.constant 0.000000e+00 : f32
    %57 = vector.broadcast %cst_21 : f32 to vector<32x128xf32>
    %58 = arith.select %55, %56, %57 : vector<32x128xi1>, vector<32x128xf32>
    %c14_i32_22 = arith.constant 14 : i32
    %59 = vector.broadcast %c14_i32_22 : i32 to vector<32x128xi32>
    %60 = arith.cmpi sle, %53, %59 : vector<32x128xi32>
    %c31_i32_23 = arith.constant 31 : i32
    %61 = tpu.dynamic_rotate %36 by %c31_i32_23 dim 0 : vector<32x128xf32>, i32 -> vector<32x128xf32>
    %cst_24 = arith.constant 0.000000e+00 : f32
    %62 = vector.broadcast %cst_24 : f32 to vector<32x128xf32>
    %63 = arith.select %60, %61, %62 : vector<32x128xi1>, vector<32x128xf32>
    %64 = tpu.concatenate %58, %36, %63 in 1 : vector<32x128xf32>, vector<32x128xf32>, vector<32x128xf32> -> vector<32x384xf32>
    %65 = arith.truncf %64 : vector<32x384xf32> to vector<32x384xbf16>
    %c0_25 = arith.constant 0 : index
    %c0_26 = arith.constant 0 : index
    %66 = vector.load %arg4[%c0_25, %c0_26] : memref<384x128xbf16, #tpu.memory_space<vmem>>, vector<384x128xbf16>
    %cst_27 = arith.constant dense<0.000000e+00> : vector<32x128xf32>
    %67 = tpu.matmul %65, %66, %cst_27 {dimension_numbers = #tpu.dot_dimension_numbers<[1], [0], [0], [1], [0, 0, 1, 1], [], []>} : vector<32x384xbf16>, vector<384x128xbf16>, vector<32x128xf32> -> vector<32x128xf32>
    %c0_28 = arith.constant 0 : index
    %c0_29 = arith.constant 0 : index
    %68 = vector.load %arg5[%c0_28, %c0_29] : memref<1x128xf32, #tpu.memory_space<vmem>>, vector<1x128xf32>
    %69 = vector.broadcast %68 : vector<1x128xf32> to vector<32x128xf32>
    %70 = arith.addf %67, %69 : vector<32x128xf32>
    %cst_30 = arith.constant 0.000000e+00 : f32
    %71 = vector.broadcast %cst_30 : f32 to vector<32x128xf32>
    %72 = arith.maximumf %70, %71 : vector<32x128xf32>
    %73 = arith.addf %36, %72 : vector<32x128xf32>
    %74 = vector.extract_strided_slice %73 {offsets = [0, 0], sizes = [16, 128], strides = [1, 1]} : vector<32x128xf32> to vector<16x128xf32>
    %cst_31 = arith.constant dense<0.000000e+00> : vector<128xf32>
    %75 = vector.multi_reduction <add>, %74, %cst_31 [0] : vector<16x128xf32> to vector<128xf32>
    %76 = vector.shape_cast %75 : vector<128xf32> to vector<1x128xf32>
    %77 = vector.extract_strided_slice %73 {offsets = [16, 0], sizes = [16, 128], strides = [1, 1]} : vector<32x128xf32> to vector<16x128xf32>
    %cst_32 = arith.constant dense<0.000000e+00> : vector<128xf32>
    %78 = vector.multi_reduction <add>, %77, %cst_32 [0] : vector<16x128xf32> to vector<128xf32>
    %79 = vector.shape_cast %78 : vector<128xf32> to vector<1x128xf32>
    %80 = tpu.concatenate %76, %79 in 0 : vector<1x128xf32>, vector<1x128xf32> -> vector<2x128xf32>
    %81 = arith.truncf %80 : vector<2x128xf32> to vector<2x128xbf16>
    %c0_33 = arith.constant 0 : index
    %c0_34 = arith.constant 0 : index
    %82 = vector.load %arg6[%c0_33, %c0_34] : memref<128x128xbf16, #tpu.memory_space<vmem>>, vector<128x128xbf16>
    %cst_35 = arith.constant dense<0.000000e+00> : vector<2x128xf32>
    %83 = tpu.matmul %81, %82, %cst_35 {dimension_numbers = #tpu.dot_dimension_numbers<[1], [0], [0], [1], [0, 0, 1, 1], [], []>} : vector<2x128xbf16>, vector<128x128xbf16>, vector<2x128xf32> -> vector<2x128xf32>
    %c0_36 = arith.constant 0 : index
    %c0_37 = arith.constant 0 : index
    %84 = vector.load %arg7[%c0_36, %c0_37] : memref<1x128xf32, #tpu.memory_space<vmem>>, vector<1x128xf32>
    %85 = vector.broadcast %84 : vector<1x128xf32> to vector<2x128xf32>
    %86 = arith.addf %83, %85 : vector<2x128xf32>
    %c0_38 = arith.constant 0 : index
    %c0_39 = arith.constant 0 : index
    %87 = vector.load %arg8[%c0_38, %c0_39] : memref<2x128xf32, #tpu.memory_space<vmem>>, vector<2x128xf32>
    tpu.vector_store %arg8[%c0_38, %c0_39], %86 {strides = array<i32>} : memref<2x128xf32, #tpu.memory_space<vmem>>, vector<2x128xf32>,
    return
  }
  func.func @transform_0(%arg0: i32) -> (i32, i32) {
    %c0_i32 = arith.constant 0 : i32
    %c0_i32_0 = arith.constant 0 : i32
    return %arg0, %c0_i32 : i32, i32
  }
  func.func @transform_1(%arg0: i32) -> (i32, i32) {
    %c0_i32 = arith.constant 0 : i32
    %c0_i32_0 = arith.constant 0 : i32
    %c0_i32_1 = arith.constant 0 : i32
    return %c0_i32, %c0_i32_0 : i32, i32
  }
  func.func @transform_2(%arg0: i32) -> (i32, i32) {
    %c0_i32 = arith.constant 0 : i32
    %c0_i32_0 = arith.constant 0 : i32
    %c0_i32_1 = arith.constant 0 : i32
    return %c0_i32, %c0_i32_0 : i32, i32
  }
  func.func @transform_3(%arg0: i32) -> (i32, i32) {
    %c0_i32 = arith.constant 0 : i32
    %c0_i32_0 = arith.constant 0 : i32
    %c0_i32_1 = arith.constant 0 : i32
    return %c0_i32, %c0_i32_0 : i32, i32
  }
  func.func @transform_4(%arg0: i32) -> (i32, i32) {
    %c0_i32 = arith.constant 0 : i32
    %c0_i32_0 = arith.constant 0 : i32
    %c0_i32_1 = arith.constant 0 : i32
    return %c0_i32, %c0_i32_0 : i32, i32
  }
  func.func @transform_5(%arg0: i32) -> (i32, i32) {
    %c0_i32 = arith.constant 0 : i32
    %c0_i32_0 = arith.constant 0 : i32
    %c0_i32_1 = arith.constant 0 : i32
    return %c0_i32, %c0_i32_0 : i32, i32
  }
  func.func @transform_6(%arg0: i32) -> (i32, i32) {
    %c0_i32 = arith.constant 0 : i32
    %c0_i32_0 = arith.constant 0 : i32
    %c0_i32_1 = arith.constant 0 : i32
    return %c0_i32, %c0_i32_0 : i32, i32
  }
  func.func @transform_7(%arg0: i32) -> (i32, i32) {
    %c0_i32 = arith.constant 0 : i32
    %c0_i32_0 = arith.constant 0 : i32
    return %arg0, %c0_i32 : i32, i32
  }
}

</mosaic_0001>

<bundles_post_ra>
// kernel: fused_supernet_block.1
= control target key start
LH: loop header
LB: loop body
LE: loop exit
PB: predicated region body
PF: predicated region fallthrough
CT: control target
= control target key end

     0   :  { %v32_v3 = vlaneseq  ;;  %v1016_v6 = vmov 0   ;;  %s1017_s11 = smov 64   ;;  %vm135_vm2 = vcmask 523264   ;;  %s1351_s0 = inlined_call_operand.vmem [shape: f32[32,64], index: 0, kind: input, shape index: {}]   ;;  %s1352_s1 = inlined_call_operand.vmem [shape: bf16[192,128], index: 1, kind: input, shape index: {}]   ;;  %s1353_s2 = inlined_call_operand.vmem [shape: f32[1,128], index: 2, kind: input, shape index: {}]   ;;  %s1354_s3 = inlined_call_operand.vmem [shape: bf16[384,128], index: 3, kind: input, shape index: {}]   ;;  %s1355_s4 = inlined_call_operand.vmem [shape: f32[1,128], index: 4, kind: input, shape index: {}]   ;;  %s1356_s5 = inlined_call_operand.vmem [shape: bf16[128,128], index: 5, kind: input, shape index: {}]   ;;  %s1357_s6 = inlined_call_operand.vmem [shape: f32[1,128], index: 6, kind: input, shape index: {}]   ;;  %s1358_s7 = inlined_call_operand.hbm [shape: f32[2,128], index: 7, kind: output, shape index: {}]  }
   0x1   :  { %v28_v0 = vld [vmem:[%s1351_s0] sm:$0xff]  ;;  %v29_v1 = vld [vmem:[%s1351_s0 + $0x8] sm:$0xff]  ;;  %v30_v2 = vld [vmem:[%s1351_s0 + $0x10] sm:$0xff]  ;;  %253 = vmatprep.subr.bf16.mxu0 %v1016_v6 }
   0x2   :  { %v938_v4 = vpack.i.bf16 %v29_v1, %v28_v0  ;;  %v31_v5 = vld [vmem:[%s1351_s0 + $0x18] sm:$0xff]  ;;  %v948_v7 = vld [vmem:[%s1352_s1] sm:$0xff]   ;;  %v107_v8 = vrot.slane %v29_v1, 1  ;;  %v949_v11 = vld [vmem:[%s1352_s1 + $0x8] sm:$0xff]   ;;  %v1081_v12 = vshrl.u32 %v32_v3, 7  ;;  %v106_v13 = vrot.slane %v28_v0, 1 }
   0x3   :  { %v109_v9 = vrot.slane %v31_v5, 1  ;;  %v943_v10 = vpack.i.bf16 %v31_v5, %v30_v2  ;;  %254 = vmatpush1.bf16.msra.mxu0 %v948_v7  ;;  %v108_v14 = vrot.slane %v30_v2, 1  ;;  %v950_v16 = vld [vmem:[%s1352_s1 + $0x10] sm:$0xff]   ;;  %v90_v20 = vrot.slane %v29_v1, 7  ;;  %v951_v28 = vld [vmem:[%s1352_s1 + $0x18] sm:$0xff]   ;;  %v952_v30 = vld [vmem:[%s1352_s1 + $0x20] sm:$0xff]  }
   0x4   :  { %939 = vrot.lane.b32.xlu0 %v938_v4, %s1017_s11  ;;  %255 = vmatprep.subr.bf16.mxu0 %v1016_v6  ;;  %v34_v15 = vadd.s32 8, %v1081_v12  ;;  %vm110_vm0 = vcmp.lt.s32.totalorder %v1081_v12, 7  ;;  %v89_v21 = vrot.slane %v28_v0, 7  ;;  %v92_v24 = vrot.slane %v31_v5, 7  ;;  %v960_v36 = vld [vmem:[%s1354_s3 + $0x40] sm:$0xff]   ;;  %v962_v39 = vld [vmem:[%s1354_s3 + $0x48] sm:$0xff]  }
   0x5   :  { %v112_v18 = vsel %vm110_vm0, %v107_v8, %v108_v14  ;;  %v111_v19 = vsel %vm110_vm0, %v108_v14, %v109_v9  ;;  %v113_v22 = vsel %vm110_vm0, %v106_v13, %v107_v8  ;;  %v114_v23 = vsel %vm110_vm0, %v109_v9, %v106_v13  ;;  %v961_v38 = vld [vmem:[%s1354_s3] sm:$0xff]   ;;  %845 = vmatprep.subr.bf16.mxu1 %v960_v36  ;;  %v963_v41 = vld [vmem:[%s1354_s3 + $0x8] sm:$0xff]   ;;  %v964_v43 = vld [vmem:[%s1354_s3 + $0x50] sm:$0xff]  }
   0x6   :  { %v48_v17 = vand.u32 15, %v34_v15  ;;  %v91_v26 = vrot.slane %v30_v2, 7  ;;  %vm93_vm3 = vcmp.lt.s32.totalorder %v1081_v12, 1  ;;  %v36_v33 = vadd.s32 24, %v1081_v12  ;;  %846 = vmatpush3.bf16.msra.mxu1 %v961_v38  ;;  %v953_v44 = vld [vmem:[%s1352_s1 + $0x28] sm:$0xff]   ;;  %v965_v46 = vld [vmem:[%s1354_s3 + $0x10] sm:$0xff]  }
   0x7   :  { %256 = vmatpush1.bf16.msra.mxu0 %v949_v11  ;;  %v96_v31 = vsel %vm93_vm3, %v89_v21, %v90_v20  ;;  %v97_v32 = vsel %vm93_vm3, %v92_v24, %v89_v21  ;;  %847 = vmatprep.subr.bf16.mxu1 %v962_v39  ;;  %v966_v47 = vld [vmem:[%s1354_s3 + $0x58] sm:$0xff]   ;;  %v954_v48 = vld [vmem:[%s1352_s1 + $0x30] sm:$0xff]   ;;  %v956_v50 = vld [vmem:[%s1352_s1 + $0x40] sm:$0xff]  }
   0x8   :  { %944 = vrot.lane.b32.xlu0 %v943_v10, %s1017_s11  ;;  %257 = vmatprep.subr.bf16.mxu0 %v1016_v6  ;;  %vm1098_vm1 = vcmp.le.s32.totalorder %v48_v17, 14  ;;  %v1120_v34 = vsel %vm93_vm3, %v91_v26, %v92_v24  ;;  %v1124_v35 = vsel %vm93_vm3, %v90_v20, %v91_v26  ;;  %v62_v37 = vand.u32 15, %v36_v33  ;;  %v955_v49 = vld [vmem:[%s1352_s1 + $0x38] sm:$0xff]   ;;  %v957_v51 = vld [vmem:[%s1352_s1 + $0x48] sm:$0xff]  }
   0x9   :  { %v116_v27 = vsel %vm1098_vm1, %v112_v18, 0.0 }
   0xa   :  { %v141_v29 = vpack.c.bf16 %v116_v27, %v113_v22  ;;  %vm1136_vm4 = vcmp.le.s32.totalorder %v62_v37, 14  ;;  %848 = vmatpush3.bf16.msra.mxu1 %v963_v41 }
   0xb   :  { %258 = vmatpush1.bf16.msra.mxu0 %v950_v16  ;;  %v118_v42 = vsel %vm1136_vm4, %v114_v23, 0.0  ;;  %849 = vmatprep.subr.bf16.mxu1 %v964_v43 }
   0xc   :  { %259 = vmatprep.subr.bf16.mxu0 %v1016_v6  ;;  %797 = vmatprep.mubr.msk.bf16.mxu0 %vm135_vm2, %v141_v29  ;;  %v143_v45 = vpack.c.bf16 %v118_v42, %v111_v19 }
   0xe   :  { %850 = vmatpush3.bf16.msra.mxu1 %v965_v46 }
   0xf   :  { %260 = vmatpush1.bf16.msra.mxu0 %v951_v28  ;;  %851 = vmatprep.subr.bf16.mxu1 %v966_v47 }
  0x10   :  { %261 = vmatprep.subr.bf16.mxu0 %v1016_v6 }
  0x13   :  { %262 = vmatpush1.bf16.msra.mxu0 %v952_v30 }
  0x14   :  { %263 = vmatprep.subr.bf16.mxu0 %v1016_v6 }
  0x17   :  { %264 = vmatpush1.bf16.msra.mxu0 %v953_v44 }
  0x18   :  { %265 = vmatprep.subr.bf16.mxu0 %v1016_v6 }
  0x1b   :  { %266 = vmatpush1.bf16.msra.mxu0 %v954_v48 }
  0x1c   :  { %267 = vmatprep.subr.bf16.mxu0 %v1016_v6 }
  0x1f   :  { %268 = vmatpush1.bf16.msra.mxu0 %v955_v49 }
  0x20   :  { %269 = vmatprep.subr.bf16.mxu0 %v1016_v6 }
  0x23   :  { %270 = vmatpush1.bf16.msra.mxu0 %v956_v50 }
  0x24   :  { %271 = vmatprep.subr.bf16.mxu0 %v1016_v6 }
  0x25   :  { %12 = vsyncpa [#allocation3], 0  ;;  %v958_v52 = vld [vmem:[%s1352_s1 + $0x50] sm:$0xff]   ;;  %v959_v53 = vld [vmem:[%s1352_s1 + $0x58] sm:$0xff]   ;;  %v41_v54 = vand.u32 15, %v1081_v12  ;;  %v35_v55 = vadd.s32 16, %v1081_v12 }
  0x26   :  { %v967_v9 = vld [vmem:[%s1354_s3 + $0x18] sm:$0xff]   ;;  %v968_v10 = vld [vmem:[%s1354_s3 + $0x60] sm:$0xff]   ;;  %v970_v13 = vld [vmem:[%s1354_s3 + $0x68] sm:$0xff]   ;;  %vm1018_vm7 = vmmov 1   ;;  %vm1020_vm12 = vmmov 0   ;;  %vm655_vm13 = vcmask 1040384  }
  0x27   :  { %272 = vmatpush1.bf16.msra.mxu0 %v957_v51  ;;  %vm1184_vm5 = vcmp.ge.s32.totalorder %v41_v54, 1  ;;  %v55_v57 = vand.u32 15, %v35_v55  ;;  %852 = vmatpush3.bf16.msra.mxu1 %v967_v9  ;;  %v969_v11 = vld [vmem:[%s1354_s3 + $0x20] sm:$0xff]   ;;  %v971_v14 = vld [vmem:[%s1354_s3 + $0x28] sm:$0xff]   ;;  %v972_v15 = vld [vmem:[%s1354_s3 + $0x70] sm:$0xff]   ;;  %s1021_s23 = smov [#allocation2]  }
  0x28   :  { %273 = vmatprep.subr.bf16.mxu0 %v1016_v6  ;;  %v98_v59 = vsel %vm1184_vm5, %v97_v32, 0.0  ;;  %853 = vmatprep.subr.bf16.mxu1 %v968_v10  ;;  %v973_v16 = vld [vmem:[%s1354_s3 + $0x30] sm:$0xff]   ;;  %v974_v17 = vld [vmem:[%s1354_s3 + $0x78] sm:$0xff]   ;;  %v976_v19 = vld [vmem:[%s1354_s3 + $0x80] sm:$0xff]   ;;  %s776_s24 = sshll.u32 %s1021_s23, 4  ;;  %s777_s24 = int_to_ptr.vmem [resolvable:$true] %s776_s24 }
  0x29   :  { %vm1190_vm6 = vcmp.ge.s32.totalorder %v55_v57, 1  ;;  %v975_v18 = vld [vmem:[%s1354_s3 + $0x38] sm:$0xff]   ;;  %v784_v20 = vld [vmem:[%s1353_s2] ss:$0 sm:$0xff]  ;;  %vm824_vm8 = vmpackc.low %vm1018_vm7, %vm1184_vm5  ;;  %s992_s25 = scalar_lea.vmem %s777_s24, 32  ;;  %p997_p1 = scmp.lt.s32.totalorder %s777_s24, %s777_s24 }
  0x2a   :  { %v100_v3 = vsel %vm1190_vm6, %v1124_v35, 0.0  ;;  %v977_v46 = vld [vmem:[%s1354_s3 + $0x88] sm:$0xff]   ;;  %v978_v51 = vld [vmem:[%s1354_s3 + $0x90] sm:$0xff]   ;;  %vm827_vm9 = vmpackc.low %vm1018_vm7, %vm1190_vm6  ;;  %p993_p0 = scmp.ne.s32.totalorder %s777_s24, %s992_s25  ;;  %p998_p2 = scmp.lt.s32.totalorder %s992_s25, %s992_s25 }
  0x2b   :  { %274 = vmatpush1.bf16.msra.mxu0 %v958_v52  ;;  %854 = vmatpush3.bf16.msra.mxu1 %v969_v11  ;;  %vm830_vm10 = vmpackc.low %vm1098_vm1, %vm1018_vm7  ;;  %v981_v25 = vld [vmem:[%s1354_s3 + $0xa8] sm:$0xff]   ;;  %v983_v62 = vld [vmem:[%s1354_s3 + $0xb8] sm:$0xff]  }
  0x2c   :  { %275 = vmatprep.subr.bf16.mxu0 %v1016_v6  ;;  %855 = vmatprep.subr.bf16.mxu1 %v970_v13  ;;  %vm833_vm11 = vmpackc.low %vm1136_vm4, %vm1018_vm7  ;;  %v985_v12 = vld [vmem:[%s1356_s5 + $0x8] sm:$0xff]   ;;  %v986_v40 = vld [vmem:[%s1356_s5 + $0x10] sm:$0xff]   ;;  %p999_p3 = por %p998_p2, %p997_p1 }
  0x2d   :  { %v991_v9 = vld [vmem:[%s1356_s5 + $0x38] sm:$0xff]  }
  0x2e   :  { %p1000_p4 = pnand %p999_p3, %p993_p0 }
  0x2f   :  { %276 = vmatpush1.bf16.msra.mxu0 %v959_v53  ;;  %856 = vmatpush3.bf16.msra.mxu1 %v971_v14 }
  0x30   :  { %857 = vmatprep.subr.bf16.mxu1 %v972_v15 }
  0x33   :  { %858 = vmatpush3.bf16.msra.mxu1 %v973_v16 }
  0x34   :  { %859 = vmatprep.subr.bf16.mxu1 %v974_v17 }
  0x37   :  { %860 = vmatpush3.bf16.msra.mxu1 %v975_v18 }
  0x38   :  { %892 = vmatprep.subr.bf16.mxu1 %v976_v19 }
  0x76   :  { %v940_v58 = vpop.permute.xlu0 %939 }
  0x77   :  { %v942_v60 = vunpack.i.h.bf16 %v940_v58  ;;  %v941_v61 = vunpack.i.l.bf16 %v940_v58  ;;  %v979_v58 = vld [vmem:[%s1354_s3 + $0x98] sm:$0xff]  }
  0x79   :  { %v136_v63 = vsel %vm135_vm2, %v98_v59, %v941_v61  ;;  %v137_v0 = vsel %vm135_vm2, %v96_v31, %v942_v60  ;;  %v980_v60 = vld [vmem:[%s1354_s3 + $0xa0] sm:$0xff]   ;;  %v982_v61 = vld [vmem:[%s1354_s3 + $0xb0] sm:$0xff]  }
  0x7a   :  { %v140_v1 = vpack.c.bf16 %v137_v0, %v136_v63  ;;  %v945_v2 = vpop.permute.xlu0 %944 }
  0x7b   :  { %v947_v4 = vunpack.i.h.bf16 %v945_v2  ;;  %v946_v5 = vunpack.i.l.bf16 %v945_v2 }
  0x7c   :  { %286 = vmatmul.mubr.bf16.vlgmr.msra.gmra.mrb[0].mxu0 %v140_v1 }
  0x7d   :  { %798 = vmatprep.mubr.msk.bf16.mxu0 %vm135_vm2, %v143_v45  ;;  %v138_v6 = vsel %vm135_vm2, %v100_v3, %v946_v5  ;;  %v139_v7 = vsel %vm135_vm2, %v1120_v34, %v947_v4  ;;  %v984_v3 = vld [vmem:[%s1356_s5] sm:$0xff]   ;;  %v1019_v4 = vmov 0.0   ;;  %v987_v5 = vld [vmem:[%s1356_s5 + $0x18] sm:$0xff]  }
  0x7e   :  { %v142_v8 = vpack.c.bf16 %v139_v7, %v138_v6  ;;  %912 = vmatprep.subr.bf16.mxu0 %v1019_v4  ;;  %v988_v6 = vld [vmem:[%s1356_s5 + $0x20] sm:$0xff]   ;;  %v989_v7 = vld [vmem:[%s1356_s5 + $0x28] sm:$0xff]  }
  0x7f   :  { %913 = vmatpush3.bf16.msra.mxu0 %v984_v3 }
  0x80   :  { %914 = vmatprep.subr.bf16.mxu0 %v1019_v4 }
  0x83   :  { %915 = vmatpush3.bf16.msra.mxu0 %v985_v12 }
  0x84   :  { %294 = vmatmul.mubr.bf16.gmra.mrb[4].mxu0 %v142_v8  ;;  %916 = vmatprep.subr.bf16.mxu0 %v1019_v4  ;;  %v990_v8 = vld [vmem:[%s1356_s5 + $0x30] sm:$0xff]  }
  0x85   :  { %928 = vmatprep.mubr.msk.bf16.mxu0 %vm1020_vm12, %v1019_v4 }
  0x87   :  { %917 = vmatpush3.bf16.msra.mxu0 %v986_v40 }
  0x88   :  { %918 = vmatprep.subr.bf16.mxu0 %v1019_v4 }
  0x8b   :  { %919 = vmatpush3.bf16.msra.mxu0 %v987_v5 }
  0x8c   :  { %920 = vmatprep.subr.bf16.mxu0 %v1019_v4 }
  0x8f   :  { %921 = vmatpush3.bf16.msra.mxu0 %v988_v6 }
  0x90   :  { %922 = vmatprep.subr.bf16.mxu0 %v1019_v4 }
  0x93   :  { %923 = vmatpush3.bf16.msra.mxu0 %v989_v7 }
  0x94   :  { %924 = vmatprep.subr.bf16.mxu0 %v1019_v4 }
  0x97   :  { %925 = vmatpush3.bf16.msra.mxu0 %v990_v8 }
  0x98   :  { %926 = vmatprep.subr.bf16.mxu0 %v1019_v4 }
  0x9b   :  { %927 = vmatpush3.bf16.msra.mxu0 %v991_v9 }
 0x14f   :  { %v287_v21 = vpop.f32.mrb[0].mxu0 }
 0x150   :  { %v288_v22 = vadd.f32 %v784_v20, %v287_v21  ;;  %v289_v23 = vpop.f32.mrb[1].mxu0 }
 0x151   :  { %v290_v24 = vpop.f32.mrb[2].mxu0  ;;  %v799_v23 = vld [vmem:[%s1355_s4] ss:$0 sm:$0xff] }
 0x152   :  { %v291_v26 = vadd.f32 %v784_v20, %v290_v24  ;;  %v292_v27 = vpop.f32.mrb[3].mxu0  ;;  %v1236_v28 = vmax.f32 %v288_v22, 0.0 }
 0x154   :  { %v1238_v29 = vmax.f32 %v291_v26, 0.0  ;;  %v306_v39 = vrot.slane %v1236_v28, 7  ;;  %v318_v53 = vrot.slane %v1236_v28, 1 }
 0x156   :  { %v331_v30 = vpack.c.bf16 %v1238_v29, %v1236_v28  ;;  %v307_v37 = vrot.slane %v1238_v29, 7  ;;  %v319_v50 = vrot.slane %v1238_v29, 1 }
 0x157   :  { %v295_v31 = vpop.f32.mrb[4].mxu0 }
 0x158   :  { %v297_v32 = vpop.f32.mrb[5].mxu0  ;;  %567 = vmatprep.mubr.bf16.mxu1 %v331_v30  ;;  %v296_v36 = vadd.f32 %v784_v20, %v295_v31  ;;  %v312_v43 = vsel %vm93_vm3, %v306_v39, %v307_v37  ;;  %v324_v57 = vsel %vm110_vm0, %v318_v53, %v319_v50 }
 0x159   :  { %v298_v33 = vpop.f32.mrb[6].mxu0 }
 0x15a   :  { %v299_v34 = vadd.f32 %v784_v20, %v298_v33  ;;  %v300_v35 = vpop.f32.mrb[7].mxu0  ;;  %v1247_v42 = vmax.f32 %v296_v36, 0.0 }
 0x15c   :  { %v1243_v38 = vmax.f32 %v299_v34, 0.0  ;;  %v320_v48 = vrot.slane %v1247_v42, 1  ;;  %v308_v49 = vrot.slane %v1247_v42, 7 }
 0x15e   :  { %v309_v41 = vrot.slane %v1243_v38, 7  ;;  %v334_v47 = vpack.c.bf16 %v1243_v38, %v1247_v42  ;;  %v323_v54 = vsel %vm110_vm0, %v319_v50, %v320_v48  ;;  %v311_v55 = vsel %vm93_vm3, %v307_v37, %v308_v49 }
 0x15f   :  { %v831_v59 = vpack.c.bf16 %v323_v54, %v324_v57  ;;  %v321_v63 = vrot.slane %v1243_v38, 1 }
 0x160   :  { %v313_v44 = vsel %vm93_vm3, %v309_v41, %v306_v39  ;;  %v310_v52 = vsel %vm93_vm3, %v308_v49, %v309_v41 }
 0x161   :  { %v825_v45 = vpack.c.bf16 %v312_v43, %v313_v44  ;;  %v828_v56 = vpack.c.bf16 %v310_v52, %v311_v55  ;;  %v322_v0 = vsel %vm110_vm0, %v320_v48, %v321_v63  ;;  %v325_v1 = vsel %vm110_vm0, %v321_v63, %v318_v53 }
 0x162   :  { %v834_v2 = vpack.c.bf16 %v325_v1, %v322_v0 }
 0x163   :  { %826 = vmatmul.mubr.msk.bf16.vlgmr.msra.gmra.mrb[0].mxu1 %vm824_vm8, %v825_v45 }
 0x164   :  { %893 = vmatpush3.bf16.msra.mxu1 %v976_v19  ;;  %575 = vmatprep.mubr.bf16.mxu1 %v334_v47 }
 0x165   :  { %894 = vmatprep.subr.bf16.mxu1 %v977_v46 }
 0x168   :  { %895 = vmatpush3.bf16.msra.mxu1 %v977_v46 }
 0x169   :  { %896 = vmatprep.subr.bf16.mxu1 %v978_v51 }
 0x16b   :  { %829 = vmatmul.mubr.msk.bf16.gmra.mrb[4].mxu1 %vm827_vm9, %v828_v56 }
 0x16c   :  { %897 = vmatpush3.bf16.msra.mxu1 %v978_v51  ;;  %908 = vmatprep.mubr.msk.bf16.mxu1 %vm830_vm10, %v831_v59 }
 0x16d   :  { %898 = vmatprep.subr.bf16.mxu1 %v979_v58 }
 0x170   :  { %899 = vmatpush3.bf16.msra.mxu1 %v979_v58 }
 0x171   :  { %900 = vmatprep.subr.bf16.mxu1 %v980_v60 }
 0x174   :  { %901 = vmatpush3.bf16.msra.mxu1 %v980_v60 }
 0x175   :  { %902 = vmatprep.subr.bf16.mxu1 %v981_v25 }
 0x178   :  { %903 = vmatpush3.bf16.msra.mxu1 %v981_v25 }
 0x179   :  { %904 = vmatprep.subr.bf16.mxu1 %v982_v61 }
 0x17c   :  { %905 = vmatpush3.bf16.msra.mxu1 %v982_v61 }
 0x17d   :  { %906 = vmatprep.subr.bf16.mxu1 %v983_v62 }
 0x180   :  { %907 = vmatpush3.bf16.msra.mxu1 %v983_v62 }
 0x183   :  { %909 = vmatmul.mubr.msk.bf16.vlgmr.msra.gmra.mrb[8].mxu1 %vm833_vm11, %v834_v2 }
 0x236   :  { %v861_v10 = vpop.f32.mrb[0].mxu1 }
 0x237   :  { %v862_v11 = vpop.f32.mrb[1].mxu1 }
 0x238   :  { %v863_v13 = vadd.f32 %v862_v11, %v861_v10  ;;  %v864_v14 = vpop.f32.mrb[2].mxu1 }
 0x239   :  { %v865_v15 = vpop.f32.mrb[3].mxu1 }
 0x23a   :  { %v866_v16 = vadd.f32 %v865_v15, %v864_v14  ;;  %v570_v27 = vadd.f32 %v863_v13, %v799_v23 }
 0x23c   :  { %v573_v35 = vadd.f32 %v866_v16, %v799_v23 }
 0x23e   :  { %v867_v17 = vpop.f32.mrb[4].mxu1 }
 0x23f   :  { %v868_v18 = vpop.f32.mrb[5].mxu1 }
 0x240   :  { %v869_v19 = vadd.f32 %v868_v18, %v867_v17  ;;  %v870_v20 = vpop.f32.mrb[6].mxu1 }
 0x241   :  { %v871_v21 = vpop.f32.mrb[7].mxu1 }
 0x242   :  { %v872_v22 = vadd.f32 %v871_v21, %v870_v20  ;;  %v578_v24 = vadd.f32 %v869_v19, %v799_v23 }
 0x244   :  { %v581_v32 = vadd.f32 %v872_v22, %v799_v23 }
 0x256   :  { %v910_v26 = vpop.f32.mrb[8].mxu1 }
 0x257   :  { %v627_v30 = vadd.f32 %v910_v26, %v578_v24  ;;  %v618_v31 = vpop.f32.mrb[9].mxu1 }
 0x258   :  { %v619_v33 = vadd.f32 %v618_v31, %v570_v27  ;;  %v911_v34 = vpop.f32.mrb[10].mxu1 }
 0x259   :  { %v635_v36 = vmax.f32 %v627_v30, 0.0  ;;  %v630_v37 = vadd.f32 %v911_v34, %v581_v32  ;;  %v621_v39 = vpop.f32.mrb[11].mxu1 }
 0x25a   :  { %v633_v41 = vmax.f32 %v619_v33, 0.0  ;;  %v622_v43 = vadd.f32 %v621_v39, %v573_v35 }
 0x25b   :  { %v636_v44 = vmax.f32 %v630_v37, 0.0  ;;  %v639_v46 = vadd.f32 %v635_v36, %v1247_v42 }
 0x25c   :  { %v634_v45 = vmax.f32 %v622_v43, 0.0  ;;  %v637_v48 = vadd.f32 %v633_v41, %v1236_v28  ;;  %v836_v28 = vld [vmem:[%s1357_s6] ss:$0 sm:$0xff] }
 0x25d   :  { %v640_v47 = vadd.f32 %v636_v44, %v1243_v38 }
 0x25e   :  { %v638_v49 = vadd.f32 %v634_v45, %v1238_v29 }
 0x25f   :  { %v648_v50 = vadd.f32 %v640_v47, %v639_v46 }
 0x260   :  { %v641_v51 = vadd.f32 %v638_v49, %v637_v48 }
 0x261   :  { %v649_v52 = vrot.slane %v648_v50, 4 }
 0x262   :  { %v642_v53 = vrot.slane %v641_v51, 4 }
 0x263   :  { %v650_v54 = vadd.f32 %v649_v52, %v648_v50 }
 0x264   :  { %v643_v55 = vadd.f32 %v642_v53, %v641_v51 }
 0x265   :  { %v651_v56 = vrot.slane %v650_v54, 2 }
 0x266   :  { %v644_v57 = vrot.slane %v643_v55, 2 }
 0x267   :  { %v652_v58 = vadd.f32 %v651_v56, %v650_v54 }
 0x268   :  { %v645_v59 = vadd.f32 %v644_v57, %v643_v55 }
 0x269   :  { %v653_v60 = vrot.slane %v652_v58, 1 }
 0x26a   :  { %v646_v25 = vrot.slane %v645_v59, 1 }
 0x26b   :  { %v654_v61 = vadd.f32 %v653_v60, %v652_v58 }
 0x26c   :  { %v647_v42 = vadd.f32 %v646_v25, %v645_v59 }
 0x26e   :  { %v656_v38 = vsel %vm655_vm13, %v647_v42, %v654_v61 }
 0x26f   :  { %v657_v62 = vpack.c.bf16 %v656_v38, %v656_v38 }
 0x271   :  { %929 = vmatmul.mubr.bf16.vlgmr.msra.gmra.mrb[8].mxu0 %v657_v62 }
 0x344   :  { %v763_v29 = vpop.f32.mrb[8].mxu0 }
 0x345   :  { %v764_v63 = vadd.f32 %v836_v28, %v763_v29  ;;  %v930_v0 = vpop.f32.mrb[9].mxu0 }
 0x346   :  { %v766_v1 = vpop.f32.mrb[10].mxu0 }
 0x347   :  { %769 = vst [vmem:[#allocation2] sm:$0x3] %v764_v63  ;;  %v931_v2 = vpop.f32.mrb[11].mxu0 }
 0x348   :  { %1003 = shalt.err (!%p1000_p4)
}
 0x349   :  { %s1004_s6 = scalar_lea.hbm %s1358_s7, 32 }
 0x34a   :  { %p1005_p5 = scmp.ne.s32.totalorder %s1358_s7, %s1004_s6  ;;  %p1008_p6 = scmp.lt.u32.totalorder %s1004_s6, %s1358_s7 }
 0x34c   :  { %p1010_p7 = pnand %p1008_p6, %p1005_p5 }
 0x34e   :  { %1013 = shalt.err (!%p1010_p7)
}
 0x34f   :  { %779 = dma.vmem_to_hbm [thread:$0]  %s777_s24, 32, %s1358_s7, [#allocation3]  }
 0x350   :  { %1014 = dma.done.wait [#allocation3], 32  }
 0x351   :  { %1015 = vsyncadd [#allocation3], 4294967264 }
 0x352   :  { %783 = vsyncpa [#allocation3], 1 }

</bundles_post_ra>
